<compile_context>
chip_gen: v5e
topology: v5e:2x2
jax: 0.10.0
libtpu: 0.0.40
codegen_flags: <defaults>
</compile_context>

<pallas_src>
import functools

import jax
import jax.numpy as jnp
import numpy as np
from jax.experimental import pallas as pl
from jax.experimental.pallas import tpu as pltpu


# ----------------------------- in-kernel helpers -----------------------------


def _pick_hw_chunk(hw):
    """Largest 128-multiple chunk dividing hw (else the whole hw)."""
    for cand in (512, 256, 128):
        if hw % cand == 0 and hw > cand:
            return cand
    return hw


def _fused_sum_max(x_ref, chunk):
    """One traversal of the (tb, c, hw) block producing f32 sum and max over the HW lanes.

    Each chunk is loaded once and feeds both reductions (fused pooling), instead of separate
    whole-block jnp.sum / jnp.max traversals.
    """
    tb, c, hw = x_ref.shape
    s = jnp.zeros((tb, c), jnp.float32)
    m = jnp.full((tb, c), -jnp.inf, jnp.float32)
    for i in range(hw // chunk):  # trace-time unrolled; chunk divides hw by construction
        xc = x_ref[:, :, pl.ds(i * chunk, chunk)]
        s = s + jnp.sum(xc, axis=2, dtype=jnp.float32)
        m = jnp.maximum(m, jnp.max(xc, axis=2).astype(jnp.float32))
    return s, m


def _mlp_attention(p, w1_ref, b1_ref, w2t_ref, b2_ref, tb):
    """Shared 2-layer MLP on the stacked [avg; max] pooled rows; returns (tb, C) f32 logits.

    p:       (2*tb, C) f32
    w1_ref:  (Cr, C)   lane-dense rows
    b1_ref:  (1, Cr)
    w2t_ref: (Cr, C)   (w2 transposed) lane-dense rows
    b2_ref:  (1, C)
    """
    cr, c = w1_ref.shape
    if cr >= 32:
        # Production sizes: run the tiny MLP on the otherwise idle MXU (frees the XLU/VPU).
        h = jax.lax.dot_general(p, w1_ref[...], (((1,), (1,)), ((), ())),
                                preferred_element_type=jnp.float32)      # (2*tb, Cr)
        h = jnp.maximum(h + b1_ref[...], 0.0)
        att = jnp.dot(h, w2t_ref[...], preferred_element_type=jnp.float32)  # (2*tb, C)
    else:
        # Tiny Cr: unrolled VPU/XLU path (lane reduce + lane-broadcast FMA per hidden unit).
        att = jnp.zeros((2 * tb, c), jnp.float32)
        for r in range(cr):
            w1_r = w1_ref[r:r + 1, :]                          # (1, C)
            h_r = jnp.sum(p * w1_r, axis=1, keepdims=True)     # (2*tb, 1) lane reduce
            h_r = jnp.maximum(h_r + b1_ref[:, r:r + 1], 0.0)   # bias + ReLU
            att = att + h_r * w2t_ref[r:r + 1, :]              # lane-broadcast FMA
    # Sum avg and max branches; each branch carries one copy of b2 (as in the reference).
    return att[:tb] + att[tb:] + 2.0 * b2_ref[...]             # (tb, C)


# ------------------------------ single-pass path ------------------------------


def channel_gate_kernel(x_ref, w1_ref, b1_ref, w2t_ref, b2_ref, o_ref):
    """Fused pooling + MLP + sigmoid + apply on one (tb, C, HW) block."""
    tb, c, hw = x_ref.shape
    chunk = _pick_hw_chunk(hw)
    s, m = _fused_sum_max(x_ref, chunk)                        # (tb, C) f32 each
    avg = s * (1.0 / hw)

    p = jnp.concatenate([avg, m], axis=0)                      # (2*tb, C) — one MLP eval
    att_sum = _mlp_attention(p, w1_ref, b1_ref, w2t_ref, b2_ref, tb)

    # Sigmoid: exp on the EUP + exact reciprocal (stay within 1e-5 of the reference).
    scale = pl.reciprocal(1.0 + jnp.exp(-att_sum))             # (tb, C) f32

    # Multiply in f32 (reference parity for bf16 inputs); cast only the result.
    o_ref[...] = (x_ref[...] * scale[:, :, None]).astype(o_ref.dtype)


def _channel_gate_single_pass(x_flat, w1_2d, b1_2d, w2t, b2_2d, tb, vmem_limit_bytes):
    B, C, HW = x_flat.shape
    Cr = w1_2d.shape[0]
    itemsize = jnp.dtype(x_flat.dtype).itemsize
    weight_bytes = (w1_2d.size + b1_2d.size + w2t.size + b2_2d.size) * 4
    cost = pl.CostEstimate(
        flops=3 * B * C * HW + 8 * B * C * Cr,
        transcendentals=B * C,
        bytes_accessed=2 * B * C * HW * itemsize + weight_bytes,
    )
    return pl.pallas_call(
        channel_gate_kernel,
        out_shape=jax.ShapeDtypeStruct((B, C, HW), x_flat.dtype),
        grid_spec=pltpu.PrefetchScalarGridSpec(
            num_scalar_prefetch=0,
            grid=(B // tb,),
            in_specs=[
                pl.BlockSpec((tb, C, HW), lambda b: (b, 0, 0)),
                pl.BlockSpec((Cr, C), lambda b: (0, 0)),
                pl.BlockSpec((1, Cr), lambda b: (0, 0)),
                pl.BlockSpec((Cr, C), lambda b: (0, 0)),
                pl.BlockSpec((1, C), lambda b: (0, 0)),
            ],
            out_specs=pl.BlockSpec((tb, C, HW), lambda b: (b, 0, 0)),
        ),
        compiler_params=pltpu.CompilerParams(
            dimension_semantics=("parallel",),
            vmem_limit_bytes=vmem_limit_bytes,
        ),
        cost_estimate=cost,
    )(x_flat, w1_2d, b1_2d, w2t, b2_2d)


# ------------------------------- two-pass path --------------------------------


def _pool_scale_kernel(x_ref, w1_ref, b1_ref, w2t_ref, b2_ref, scale_ref,
                       sum_acc, max_acc, *, inv_hw):
    """Pass 1: HW-tiled fused pooling with f32 accumulators; emit sigmoid scale at last tile."""
    tb, c, hwt = x_ref.shape
    h_idx = pl.program_id(1)

    @pl.when(h_idx == 0)
    def _():
        sum_acc[...] = jnp.zeros_like(sum_acc)
        max_acc[...] = jnp.full_like(max_acc, -jnp.inf)

    s, m = _fused_sum_max(x_ref, _pick_hw_chunk(hwt))
    sum_acc[...] = sum_acc[...] + s
    max_acc[...] = jnp.maximum(max_acc[...], m)

    @pl.when(h_idx == pl.num_programs(1) - 1)
    def _():
        avg = sum_acc[...] * inv_hw
        p = jnp.concatenate([avg, max_acc[...]], axis=0)       # (2*tb, C)
        att_sum = _mlp_attention(p, w1_ref, b1_ref, w2t_ref, b2_ref, tb)
        scale_ref[...] = pl.reciprocal(1.0 + jnp.exp(-att_sum))


def _apply_scale_kernel(scale_ref, x_ref, o_ref):
    """Pass 2: HW-tiled elementwise apply of the (tb, C) f32 scale."""
    o_ref[...] = (x_ref[...] * scale_ref[...][:, :, None]).astype(o_ref.dtype)


def _pick_hw_tile(HW, C, itemsize, block_budget):
    """Largest 128-multiple divisor of HW whose in+out double-buffered blocks fit; prefer >=2 steps."""
    divs = [d for d in range(HW, 0, -1) if HW % d == 0 and d % 128 == 0]
    fitting = [d for d in divs if 4 * C * d * itemsize <= block_budget]
    if not fitting:
        return 128
    for d in fitting:           # descending: largest tile with at least 2 HW steps
        if HW // d >= 2:
            return d
    return fitting[0]


def _channel_gate_two_pass(x_flat, w1_2d, b1_2d, w2t, b2_2d, vmem_limit_bytes, block_budget):
    B, C, HW = x_flat.shape
    Cr = w1_2d.shape[0]
    itemsize = jnp.dtype(x_flat.dtype).itemsize
    hw_tile = _pick_hw_tile(HW, C, itemsize, block_budget)
    n_h = HW // hw_tile
    weight_bytes = (w1_2d.size + b1_2d.size + w2t.size + b2_2d.size) * 4

    # Pass 1: pooled attention scale (B, C) f32.
    scale = pl.pallas_call(
        functools.partial(_pool_scale_kernel, inv_hw=float(1.0 / HW)),
        out_shape=jax.ShapeDtypeStruct((B, C), jnp.float32),
        grid_spec=pltpu.PrefetchScalarGridSpec(
            num_scalar_prefetch=0,
            grid=(B, n_h),
            in_specs=[
                pl.BlockSpec((1, C, hw_tile), lambda b, h: (b, 0, h)),
                pl.BlockSpec((Cr, C), lambda b, h: (0, 0)),
                pl.BlockSpec((1, Cr), lambda b, h: (0, 0)),
                pl.BlockSpec((Cr, C), lambda b, h: (0, 0)),
                pl.BlockSpec((1, C), lambda b, h: (0, 0)),
            ],
            out_specs=pl.BlockSpec((1, C), lambda b, h: (b, 0)),
            scratch_shapes=[pltpu.VMEM((1, C), jnp.float32),
                            pltpu.VMEM((1, C), jnp.float32)],
        ),
        compiler_params=pltpu.CompilerParams(
            dimension_semantics=("parallel", "arbitrary"),
            vmem_limit_bytes=vmem_limit_bytes,
        ),
        cost_estimate=pl.CostEstimate(
            flops=2 * B * C * HW + 8 * B * C * Cr,
            transcendentals=B * C,
            bytes_accessed=B * C * HW * itemsize + B * C * 4 + weight_bytes,
        ),
    )(x_flat, w1_2d, b1_2d, w2t, b2_2d)

    # Pass 2: streaming elementwise apply. (Sweep pipeline_mode=pl.Buffered(3) on v7x if blocks
    # end up small; kept at the default double-buffering here.)
    out_flat = pl.pallas_call(
        _apply_scale_kernel,
        out_shape=jax.ShapeDtypeStruct((B, C, HW), x_flat.dtype),
        grid_spec=pltpu.PrefetchScalarGridSpec(
            num_scalar_prefetch=0,
            grid=(B, n_h),
            in_specs=[
                pl.BlockSpec((1, C), lambda b, h: (b, 0)),
                pl.BlockSpec((1, C, hw_tile), lambda b, h: (b, 0, h)),
            ],
            out_specs=pl.BlockSpec((1, C, hw_tile), lambda b, h: (b, 0, h)),
        ),
        compiler_params=pltpu.CompilerParams(
            dimension_semantics=("parallel", "parallel"),
            vmem_limit_bytes=vmem_limit_bytes,
        ),
        cost_estimate=pl.CostEstimate(
            flops=B * C * HW,
            transcendentals=0,
            bytes_accessed=2 * B * C * HW * itemsize + B * C * 4,
        ),
    )(scale, x_flat)
    return out_flat


# --------------------------------- wrapper ------------------------------------


def _vmem_budgets():
    """(vmem_limit_bytes, block_budget_bytes), sized per TPU generation."""
    try:
        info = pltpu.get_tpu_info()
        vmem_cap = getattr(info, "vmem_capacity_bytes", 64 * 1024 * 1024)
    except Exception:  # pragma: no cover - conservative fallback
        vmem_cap = 64 * 1024 * 1024
    if vmem_cap >= 100 * 1024 * 1024:          # v5e / v6e: 128 MiB VMEM
        return 96 * 1024 * 1024, 48 * 1024 * 1024
    return 48 * 1024 * 1024, 24 * 1024 * 1024  # v7x: 64 MiB physical VMEM


def _pick_batch_tile(batch, bytes_per_sample, block_budget):
    """Largest divisor of batch fitting the budget, preferring >=4 (then >=2) grid steps.

    Returns None if even a single-sample block does not fit (caller switches to two-pass).
    """
    fitting = [d for d in range(batch, 0, -1)
               if batch % d == 0 and d * bytes_per_sample <= block_budget]
    if not fitting:
        return None
    for min_steps in (min(4, batch), min(2, batch), 1):
        for d in fitting:                      # descending: largest tile meeting the step target
            if batch // d >= min_steps:
                return d
    return fitting[-1]


def channel_gate(x, w1, b1, w2, b2, *, force_two_pass=False):
    """ChannelGate forward. x: [B, C, H, W]; w1: [Cr, C]; b1: [Cr]; w2: [C, Cr]; b2: [C]."""
    B, C, H, W = x.shape
    Cr = w1.shape[0]
    HW = H * W
    itemsize = jnp.dtype(x.dtype).itemsize

    vmem_limit_bytes, block_budget = _vmem_budgets()

    x_flat = x.reshape(B, C, HW)
    w1_2d = w1.astype(jnp.float32)                  # (Cr, C) lane-dense rows
    b1_2d = b1.astype(jnp.float32).reshape(1, Cr)   # (1, Cr)
    w2t = w2.T.astype(jnp.float32)                  # (Cr, C) lane-dense rows
    b2_2d = b2.astype(jnp.float32).reshape(1, C)    # (1, C)

    bytes_per_sample = 4 * C * HW * itemsize        # in + out, double-buffered
    tb = _pick_batch_tile(B, bytes_per_sample, block_budget)

    use_two_pass = (force_two_pass or tb is None) and (HW % 128 == 0)
    if use_two_pass:
        out_flat = _channel_gate_two_pass(x_flat, w1_2d, b1_2d, w2t, b2_2d,
                                          vmem_limit_bytes, block_budget)
        return out_flat.reshape(B, C, H, W)

    if tb is None:
        # TODO(synk): HW not a 128-multiple AND a single-sample block exceeds the budget —
        # needs a masked/padded HW-tiled (or NHWC-relayout) path; fall back to tb=1 for now.
        tb = 1
    out_flat = _channel_gate_single_pass(x_flat, w1_2d, b1_2d, w2t, b2_2d, tb, vmem_limit_bytes)
    return out_flat.reshape(B, C, H, W)


# -------------------------------- reference -----------------------------------


def channel_gate_ref(x, w1, b1, w2, b2):
    """Pure-JAX reference matching the PyTorch forward (pool_types=['avg','max'])."""
    avg_pool = jnp.mean(x, axis=(2, 3))  # (B, C)
    max_pool = jnp.max(x, axis=(2, 3))   # (B, C)

    def mlp(p):
        h = jnp.maximum(p @ w1.T + b1, 0.0)
        return h @ w2.T + b2

    att = mlp(avg_pool) + mlp(max_pool)
    scale = jax.nn.sigmoid(att)[:, :, None, None]
    return x * scale


if __name__ == "__main__":
    key = jax.random.PRNGKey(0)

    def make_params(kp, C, reduction_ratio):
        Cr = max(C // reduction_ratio, 1)
        kw1, kw2 = jax.random.split(kp)
        # c2_msra_fill: kaiming normal, mode='fan_out', relu -> std = sqrt(2/fan_out); bias = 0
        w1 = jax.random.normal(kw1, (Cr, C), dtype=jnp.float32) * np.sqrt(2.0 / Cr)
        b1 = jnp.zeros((Cr,), dtype=jnp.float32)
        w2 = jax.random.normal(kw2, (C, Cr), dtype=jnp.float32) * np.sqrt(2.0 / C)
        b2 = jnp.zeros((C,), dtype=jnp.float32)
        return w1, b1, w2, b2

    # (B, C, H, W, reduction_ratio, force_two_pass)
    configs = [
        (2, 32, 16, 16, 16, False),  # single-pass path, grid has 2 steps (tb capped)
        (2, 32, 16, 16, 16, True),   # two-pass path (HW-tiled pooling + apply), n_h = 2
    ]
    for (B, C, H, W, rr, force_two) in configs:
        key, kp, kd = jax.random.split(key, 3)
        w1, b1, w2, b2 = make_params(kp, C, rr)
        x = jax.random.normal(kd, (B, C, H, W), dtype=jnp.float32)

        out = jax.block_until_ready(channel_gate(x, w1, b1, w2, b2, force_two_pass=force_two))
        ref = jax.block_until_ready(channel_gate_ref(x, w1, b1, w2, b2))
        np.testing.assert_allclose(np.asarray(out), np.asarray(ref), rtol=1e-5, atol=1e-5)

    print("KERNEL_OK")
</pallas_src>

<mosaic_0001>
module attributes {stable_mosaic.version = 11 : i64} {
  func.func @channel_gate_kernel(%arg0: i32, %arg1: memref<1x32x256xf32, #tpu.memory_space<vmem>>, %arg2: memref<2x32xf32, #tpu.memory_space<vmem>>, %arg3: memref<1x2xf32, #tpu.memory_space<vmem>>, %arg4: memref<2x32xf32, #tpu.memory_space<vmem>>, %arg5: memref<1x32xf32, #tpu.memory_space<vmem>>, %arg6: memref<1x32x256xf32, #tpu.memory_space<vmem>>) attributes {dimension_semantics = [#tpu.dimension_semantics<parallel>], iteration_bounds = array<i64: 2>, scalar_prefetch = 0 : i64, scratch_operands = 0 : i64, tpu.core_type = #tpu.core_type<tc>, window_params = [{transform_indices = @transform_0, window_bounds = array<i64: 1, 32, 256>}, {pipeline_mode = #tpu.pipeline_mode<synchronous>, transform_indices = @transform_1, window_bounds = array<i64: 2, 32>}, {pipeline_mode = #tpu.pipeline_mode<synchronous>, transform_indices = @transform_2, window_bounds = array<i64: 1, 2>}, {pipeline_mode = #tpu.pipeline_mode<synchronous>, transform_indices = @transform_3, window_bounds = array<i64: 2, 32>}, {pipeline_mode = #tpu.pipeline_mode<synchronous>, transform_indices = @transform_4, window_bounds = array<i64: 1, 32>}, {transform_indices = @transform_5, window_bounds = array<i64: 1, 32, 256>}]} {
    %cst = arith.constant 0.000000e+00 : f32
    %0 = vector.broadcast %cst : f32 to vector<1x32xf32>
    %cst_0 = arith.constant 0xFF800000 : f32
    %1 = vector.broadcast %cst_0 : f32 to vector<1x32xf32>
    %c0 = arith.constant 0 : index
    %c0_1 = arith.constant 0 : index
    %c0_2 = arith.constant 0 : index
    %2 = vector.load %arg1[%c0, %c0_1, %c0_2] : memref<1x32x256xf32, #tpu.memory_space<vmem>>, vector<1x32x128xf32>
    %cst_3 = arith.constant dense<0.000000e+00> : vector<1x32xf32>
    %3 = vector.multi_reduction <add>, %2, %cst_3 [2] : vector<1x32x128xf32> to vector<1x32xf32>
    %4 = arith.addf %0, %3 : vector<1x32xf32>
    %cst_4 = arith.constant dense<0xFF800000> : vector<1x32xf32>
    %5 = vector.multi_reduction <maximumf>, %2, %cst_4 [2] : vector<1x32x128xf32> to vector<1x32xf32>
    %6 = arith.maximumf %1, %5 : vector<1x32xf32>
    %c0_5 = arith.constant 0 : index
    %c0_6 = arith.constant 0 : index
    %c128 = arith.constant 128 : index
    %7 = vector.load %arg1[%c0_5, %c0_6, %c128] : memref<1x32x256xf32, #tpu.memory_space<vmem>>, vector<1x32x128xf32>
    %cst_7 = arith.constant dense<0.000000e+00> : vector<1x32xf32>
    %8 = vector.multi_reduction <add>, %7, %cst_7 [2] : vector<1x32x128xf32> to vector<1x32xf32>
    %9 = arith.addf %4, %8 : vector<1x32xf32>
    %cst_8 = arith.constant dense<0xFF800000> : vector<1x32xf32>
    %10 = vector.multi_reduction <maximumf>, %7, %cst_8 [2] : vector<1x32x128xf32> to vector<1x32xf32>
    %11 = arith.maximumf %6, %10 : vector<1x32xf32>
    %cst_9 = arith.constant 3.906250e-03 : f32
    %12 = vector.broadcast %cst_9 : f32 to vector<1x32xf32>
    %13 = arith.mulf %9, %12 : vector<1x32xf32>
    %14 = tpu.concatenate %13, %11 in 0 : vector<1x32xf32>, vector<1x32xf32> -> vector<2x32xf32>
    %cst_10 = arith.constant 0.000000e+00 : f32
    %15 = vector.broadcast %cst_10 : f32 to vector<2x32xf32>
    %c0_11 = arith.constant 0 : index
    %c0_12 = arith.constant 0 : index
    %16 = vector.load %arg2[%c0_11, %c0_12] : memref<2x32xf32, #tpu.memory_space<vmem>>, vector<1x32xf32>
    %17 = vector.broadcast %16 : vector<1x32xf32> to vector<2x32xf32>
    %18 = arith.mulf %14, %17 : vector<2x32xf32>
    %cst_13 = arith.constant dense<0.000000e+00> : vector<2xf32>
    %19 = vector.multi_reduction <add>, %18, %cst_13 [1] : vector<2x32xf32> to vector<2xf32>
    %20 = vector.shape_cast %19 : vector<2xf32> to vector<2x1xf32>
    %c0_14 = arith.constant 0 : index
    %c0_15 = arith.constant 0 : index
    %21 = vector.load %arg3[%c0_14, %c0_15] : memref<1x2xf32, #tpu.memory_space<vmem>>, vector<1x1xf32>
    %22 = vector.broadcast %21 : vector<1x1xf32> to vector<2x1xf32>
    %23 = arith.addf %20, %22 : vector<2x1xf32>
    %cst_16 = arith.constant 0.000000e+00 : f32
    %24 = vector.broadcast %cst_16 : f32 to vector<2x1xf32>
    %25 = arith.maximumf %23, %24 : vector<2x1xf32>
    %c0_17 = arith.constant 0 : index
    %c0_18 = arith.constant 0 : index
    %26 = vector.load %arg4[%c0_17, %c0_18] : memref<2x32xf32, #tpu.memory_space<vmem>>, vector<1x32xf32>
    %27 = vector.broadcast %25 : vector<2x1xf32> to vector<2x32xf32>
    %28 = vector.broadcast %26 : vector<1x32xf32> to vector<2x32xf32>
    %29 = arith.mulf %27, %28 : vector<2x32xf32>
    %30 = arith.addf %15, %29 : vector<2x32xf32>
    %c1 = arith.constant 1 : index
    %c0_19 = arith.constant 0 : index
    %31 = vector.load %arg2[%c1, %c0_19] : memref<2x32xf32, #tpu.memory_space<vmem>>, vector<1x32xf32>
    %32 = vector.broadcast %31 : vector<1x32xf32> to vector<2x32xf32>
    %33 = arith.mulf %14, %32 : vector<2x32xf32>
    %cst_20 = arith.constant dense<0.000000e+00> : vector<2xf32>
    %34 = vector.multi_reduction <add>, %33, %cst_20 [1] : vector<2x32xf32> to vector<2xf32>
    %35 = vector.shape_cast %34 : vector<2xf32> to vector<2x1xf32>
    %c0_21 = arith.constant 0 : index
    %c1_22 = arith.constant 1 : index
    %36 = vector.load %arg3[%c0_21, %c1_22] : memref<1x2xf32, #tpu.memory_space<vmem>>, vector<1x1xf32>
    %37 = vector.broadcast %36 : vector<1x1xf32> to vector<2x1xf32>
    %38 = arith.addf %35, %37 : vector<2x1xf32>
    %cst_23 = arith.constant 0.000000e+00 : f32
    %39 = vector.broadcast %cst_23 : f32 to vector<2x1xf32>
    %40 = arith.maximumf %38, %39 : vector<2x1xf32>
    %c1_24 = arith.constant 1 : index
    %c0_25 = arith.constant 0 : index
    %41 = vector.load %arg4[%c1_24, %c0_25] : memref<2x32xf32, #tpu.memory_space<vmem>>, vector<1x32xf32>
    %42 = vector.broadcast %40 : vector<2x1xf32> to vector<2x32xf32>
    %43 = vector.broadcast %41 : vector<1x32xf32> to vector<2x32xf32>
    %44 = arith.mulf %42, %43 : vector<2x32xf32>
    %45 = arith.addf %30, %44 : vector<2x32xf32>
    %46 = vector.extract_strided_slice %45 {offsets = [0, 0], sizes = [1, 32], strides = [1, 1]} : vector<2x32xf32> to vector<1x32xf32>
    %47 = vector.extract_strided_slice %45 {offsets = [1, 0], sizes = [1, 32], strides = [1, 1]} : vector<2x32xf32> to vector<1x32xf32>
    %48 = arith.addf %46, %47 : vector<1x32xf32>
    %c0_26 = arith.constant 0 : index
    %c0_27 = arith.constant 0 : index
    %49 = vector.load %arg5[%c0_26, %c0_27] : memref<1x32xf32, #tpu.memory_space<vmem>>, vector<1x32xf32>
    %cst_28 = arith.constant 2.000000e+00 : f32
    %50 = vector.broadcast %cst_28 : f32 to vector<1x32xf32>
    %51 = arith.mulf %50, %49 : vector<1x32xf32>
    %52 = arith.addf %48, %51 : vector<1x32xf32>
    %cst_29 = arith.constant 0.000000e+00 : f32
    %53 = vector.broadcast %cst_29 : f32 to vector<1x32xf32>
    %54 = arith.subf %53, %52 : vector<1x32xf32>
    %55 = math.exp %54 : vector<1x32xf32>
    %cst_30 = arith.constant 1.000000e+00 : f32
    %56 = vector.broadcast %cst_30 : f32 to vector<1x32xf32>
    %57 = arith.addf %56, %55 : vector<1x32xf32>
    %58 = tpu.reciprocal %57 : vector<1x32xf32> -> vector<1x32xf32>
    %c0_31 = arith.constant 0 : index
    %c0_32 = arith.constant 0 : index
    %c0_33 = arith.constant 0 : index
    %59 = vector.load %arg1[%c0_31, %c0_32, %c0_33] : memref<1x32x256xf32, #tpu.memory_space<vmem>>, vector<1x32x256xf32>
    %60 = vector.shape_cast %58 : vector<1x32xf32> to vector<1x32x1xf32>
    %61 = vector.broadcast %60 : vector<1x32x1xf32> to vector<1x32x256xf32>
    %62 = arith.mulf %59, %61 : vector<1x32x256xf32>
    %c0_34 = arith.constant 0 : index
    %c0_35 = arith.constant 0 : index
    %c0_36 = arith.constant 0 : index
    %63 = vector.load %arg6[%c0_34, %c0_35, %c0_36] : memref<1x32x256xf32, #tpu.memory_space<vmem>>, vector<1x32x256xf32>
    tpu.vector_store %arg6[%c0_34, %c0_35, %c0_36], %62 {strides = array<i32>} : memref<1x32x256xf32, #tpu.memory_space<vmem>>, vector<1x32x256xf32>,
    return
  }
  func.func @transform_0(%arg0: i32) -> (i32, i32, i32) {
    %c0_i32 = arith.constant 0 : i32
    %c0_i32_0 = arith.constant 0 : i32
    %c0_i32_1 = arith.constant 0 : i32
    return %arg0, %c0_i32, %c0_i32_0 : i32, i32, i32
  }
  func.func @transform_1(%arg0: i32) -> (i32, i32) {
    %c0_i32 = arith.constant 0 : i32
    %c0_i32_0 = arith.constant 0 : i32
    %c0_i32_1 = arith.constant 0 : i32
    return %c0_i32, %c0_i32_0 : i32, i32
  }
  func.func @transform_2(%arg0: i32) -> (i32, i32) {
    %c0_i32 = arith.constant 0 : i32
    %c0_i32_0 = arith.constant 0 : i32
    %c0_i32_1 = arith.constant 0 : i32
    return %c0_i32, %c0_i32_0 : i32, i32
  }
  func.func @transform_3(%arg0: i32) -> (i32, i32) {
    %c0_i32 = arith.constant 0 : i32
    %c0_i32_0 = arith.constant 0 : i32
    %c0_i32_1 = arith.constant 0 : i32
    return %c0_i32, %c0_i32_0 : i32, i32
  }
  func.func @transform_4(%arg0: i32) -> (i32, i32) {
    %c0_i32 = arith.constant 0 : i32
    %c0_i32_0 = arith.constant 0 : i32
    %c0_i32_1 = arith.constant 0 : i32
    return %c0_i32, %c0_i32_0 : i32, i32
  }
  func.func @transform_5(%arg0: i32) -> (i32, i32, i32) {
    %c0_i32 = arith.constant 0 : i32
    %c0_i32_0 = arith.constant 0 : i32
    %c0_i32_1 = arith.constant 0 : i32
    return %arg0, %c0_i32, %c0_i32_0 : i32, i32, i32
  }
}

</mosaic_0001>

<bundles_post_ra>
// kernel: tpu_custom_call.1
= control target key start
LH: loop header
LB: loop body
LE: loop exit
PB: predicated region body
PF: predicated region fallthrough
CT: control target
= control target key end

     0   :  { %s1088_s0 = inlined_call_operand.hbm [shape: f32[2,32,256], index: 0, kind: input, shape index: {}]   ;;  %s1089_s1 = inlined_call_operand.hbm [shape: f32[2,32], index: 1, kind: input, shape index: {}]   ;;  %s1090_s2 = inlined_call_operand.hbm [shape: f32[1,2], index: 2, kind: input, shape index: {}]   ;;  %s1091_s3 = inlined_call_operand.vmem [shape: f32[2,32], index: 3, kind: input, shape index: {}]   ;;  %s1092_s4 = inlined_call_operand.vmem [shape: f32[1,32], index: 4, kind: input, shape index: {}]   ;;  %s1093_s5 = inlined_call_operand.hbm [shape: f32[2,32,256], index: 5, kind: output, shape index: {}]  }
   0x1   :  { %1094 = sst [smem:[#allocation12_spill]] %s1089_s1 }
   0x2   :  { %1095 = sst [smem:[#allocation13_spill]] %s1090_s2 }
   0x3   :  { %10 = vsyncpa [#allocation3], 0 }
   0x4   :  { %12 = vsyncpa [#allocation3 + $0x1], 0 }
   0x5   :  { %13 = vsyncpa [#allocation6], 0 }
   0x6   :  { %14 = vsyncpa [#allocation4], 0 }
   0x7   :  { %16 = vsyncpa [#allocation4 + $0x1], 0  ;;  %s890_s18 = smov 0   ;;  %s892_s19 = smov 0  }
   0x8   :  { %s894_s20 = smov 0   ;;  %s896_s21 = smov 0  }
   0x9 LB: > { %s911_s22 = sadd.s32 4294967295, %s850_s21   ;;  %s581_s23 = sadd.s32 4294967294, %s850_s21   ;;  %s850_s21 = sphi %s896_s21, %s1108_s21   ;;  %s846_s20 = sphi %s894_s20, %s1107_s20   ;;  %s842_s19 = sphi %s892_s19, %s1106_s19   ;;  %s838_s18 = sphi %s890_s18, %s1105_s18  }
   0xa   : > { %s915_s24 = sadd.s32 1, %s850_s21   ;;  %s29_s25 = sadd.s32 1, %s846_s20 }
   0xb   : > { %s26_s26 = ssub.s32 %s850_s21, %s915_s24  ;;  %p36_p0 = scmp.ne.s32.totalorder %s846_s20, %s842_s19 }
   0xc   : > { %p27_p1 = scmp.eq.s32.totalorder %s26_s26, 0  ;;  %p37_p2 = scmp.eq.s32.totalorder %s850_s21, 0 }
   0xd   : > { %p42_p3 = scmp.ne.s32.totalorder %s842_s19, %s838_s18  ;;  %p43_p4 = scmp.eq.s32.totalorder %s911_s22, 0 }
   0xe   : > { %s927_s27 = scalar_select %p27_p1, %s846_s20, %s29_s25  }
   0xf   : > { %p929_p5 = por %p37_p2, %p36_p0  ;;  %p935_p6 = por %p43_p4, %p42_p3 }
  0x10   : > { %p150_p7 = scmp.eq.s32.totalorder %s911_s22, 1  ;;  %p156_p8 = scmp.eq.s32.totalorder %s581_s23, 1 }
  0x11   : > { %p582_p9 = scmp.ge.s32.totalorder %s850_s21, 1  ;;  %p163_p10 = scmp.lt.s32.totalorder %s850_s21, 3 }
  0x12   : > { %p942_p11 = por %p150_p7, %p36_p0  ;;  %p946_p12 = por %p156_p8, %p42_p3 }
  0x13   : > { %p950_p13 = pnand %p582_p9, %p163_p10  ;;  %s1101_s1 = sld [smem:[#allocation12_spill]] }
  0x14   : > { %s852_s11 = smov [#allocation5]   ;;  %p630_p3 = scmp.lt.s32.totalorder %s850_s21, 2 }
  0x15   : > { %p613_p1 = pneg %p950_p13  ;;  %s177_s12 = sshll.u32 %s852_s11, 4  ;;  %s178_s12 = int_to_ptr.vmem [resolvable:$true] %s177_s12 }
  0x16   : > { %s1102_s2 = sld [smem:[#allocation13_spill]]  ;;  %p968_p7 = pnand %p630_p3, %p929_p5 }
  0x17   : > { %p614_p2 = pnand %p613_p1, %p43_p4  ;;  %s853_s17 = smov [#allocation7]  }
  0x18   : > { %s189_s23 = sshll.u32 %s853_s17, 4  ;;  %s206_s25 = sand.u32 1, %s846_s20   ;;  %s190_s23 = int_to_ptr.vmem [resolvable:$true] %s189_s23 }
  0x19   : > { %s175_s10 = sshll.u32 %s1101_s1, 4  ;;  %s586_s26 = sshll.u32 %s206_s25, 6  ;;  %s176_s10 = int_to_ptr.hbm [resolvable:$true] %s175_s10 }
  0x1a   : > { %616 = dma.hbm_to_vmem [thread:$0]  (!%p614_p2), %s176_s10, 32, %s178_s12, [#allocation6]  }
  0x1b   : > { %s599_s8 = sshll.u32 %s850_s21, 6  ;;  %s210_s14 = scalar_lea.vmem [#allocation2], %s586_s26 }
  0x1c   : > { %s187_s15 = sshll.u32 %s1102_s2, 4  ;;  %s215_s13 = scalar_lea.hbm %s1088_s0, %s599_s8  ;;  %s188_s15 = int_to_ptr.hbm [resolvable:$true] %s187_s15 }
  0x1d   : > { %619 = dma.hbm_to_vmem [thread:$0]  (!%p614_p2), %s188_s15, 16, %s190_s23, [#allocation6]  }
  0x1e   : > { %s218_s1 = sshll.u32 %s210_s14, 4  ;;  %s216_s10 = sshll.u32 %s215_s13, 4  ;;  %s219_s1 = int_to_ptr.vmem [resolvable:$true] %s218_s1  ;;  %s217_s10 = int_to_ptr.hbm [resolvable:$true] %s216_s10 }
  0x1f   : > { %s207_s28 = scalar_lea.sflag [#allocation3], %s206_s25  ;;  %s750_s12 = sshra.s32 %s217_s10, 4  ;;  %s751_s12 = int_to_ptr.hbm [resolvable:$true] %s750_s12 }
  0x20   : > { %s752_s2 = scalar_lea.hbm %s751_s12, 64  ;;  %p754_p8 = pneg %p968_p7 }
  0x21   : > { %p753_p5 = scmp.ne.s32.totalorder %s751_s12, %s752_s2  ;;  %s757_s23 = scalar_lea.hbm %s1088_s0, 128 }
  0x22   : > { %p758_p1 = scmp.lt.s32.totalorder %s751_s12, %s1088_s0  ;;  %p759_p2 = scmp.lt.s32.totalorder %s757_s23, %s752_s2 }
  0x23   : > { %p755_p9 = pnand %p754_p8, %p753_p5 }
  0x24   : > { %p760_p3 = por %p759_p2, %p758_p1 }
  0x25   : > { %p756_p10 = pneg %p755_p9 }
  0x27   : > { %p761_p0 = pnand %p760_p3, %p756_p10 }
  0x29   : > { %764 = shalt.err (!%p761_p0)
}
  0x2a   : > { %s854_s25 = smov 256   ;;  %s855_s26 = smov 16  }
  0x2b   : > { %623 = dma.hbm_to_vmem [thread:$0]  (!%p968_p7), %s217_s10, 1024, %s219_s1, %s207_s28, %s854_s25, %s854_s25, %s855_s26  }
  0x2c   : > { %230 = sbr.rel (%p950_p13) target bundleno = 626 (0x272), region = 40  ;;  %s990_s11 = sand.u32 (!%p950_p13), 1, %s842_s19  }
  0x2d   : > { %s590_s13 = sshll.u32 (!%p950_p13), %s990_s11, 6  ;;  %s233_s2 = scalar_lea.sflag (!%p950_p13), [#allocation3], %s990_s11 }
  0x2e   : > { %s236_s14 = scalar_lea.vmem (!%p950_p13), [#allocation2], %s590_s13 }
  0x31   : > { %825 = dma.done.wait (%p935_p6), %s233_s2, 1024  }
  0x32   : > { %827 = vsyncadd (%p935_p6), %s233_s2, 4294966272 }
  0x33   : > { %829 = dma.done.wait (%p43_p4), [#allocation6], 48  }
  0x34   : > { %831 = vsyncadd (%p43_p4), [#allocation6], 4294967248  ;;  %v1004_v0 = vld [vmem:[%s236_s14 + $0x8] sm:$0xff]  ;;  %v1006_v1 = vld [vmem:[%s236_s14 + $0x20] sm:$0xff]  ;;  %v334_v19 = vlaneseq  ;;  %vm339_vm0 = vcmask 130112   ;;  %vm343_vm1 = vcmask 195712  }
  0x35   : > { %v1008_v2 = vld [vmem:[%s236_s14] sm:$0xff]  ;;  %302 = vadd.xlane.f32.xlu1 %v1004_v0  ;;  %282 = vadd.xlane.f32.xlu2 %v1006_v1  ;;  %v1013_v3 = vld [vmem:[%s236_s14 + $0x18] sm:$0xff]  ;;  %v1015_v4 = vld [vmem:[%s236_s14 + $0x28] sm:$0xff]  ;;  %vm347_vm2 = vcmask 261312   ;;  %vm362_vm3 = vcmask 1040384   ;;  %vm367_vm4 = vcmask 254976  }
  0x36   : > { %278 = vadd.xlane.f32.xlu0 %v1008_v2  ;;  %v1017_v5 = vld [vmem:[%s236_s14 + $0x10] sm:$0xff]  ;;  %v1027_v7 = vld [vmem:[%s236_s14 + $0x38] sm:$0xff]  ;;  %v335_v22 = vand.u32 127, %v334_v19  ;;  %v681_v51 = vld [vmem:[#allocation5 + $0x1] ss:$0 sm:$0xff]  ;;  %v856_v62 = vmov 1  }
  0x37   : > { %v1022_v6 = vld [vmem:[%s236_s14 + $0x30] sm:$0xff]  ;;  %v682_v52 = vld [vmem:[#allocation5] ss:$0 sm:$0xff]  ;;  %675 = vset.pattern.permute.xlu1 %v856_v62  ;;  %v857_v63 = vmov 0   ;;  %s273_s12 = scalar_lea.vmem [#allocation8], %s590_s13  ;;  %s600_s15 = sshll.u32 %s911_s22, 6 }
  0x38   : > { %v337_v26 = vadd.s32 4294967288, %v335_v22  ;;  %v341_v33 = vadd.s32 4294967280, %v335_v22  ;;  %v345_v37 = vadd.s32 4294967272, %v335_v22  ;;  %674 = vset.pattern.permute.xlu0 %v857_v63  ;;  %s485_s9 = scalar_lea.hbm %s1093_s5, %s600_s15  ;;  %s486_s8 = sshll.u32 %s273_s12, 4  ;;  %s487_s8 = int_to_ptr.vmem [resolvable:$true] %s486_s8 }
  0x39   : > { %s488_s25 = sshll.u32 %s485_s9, 4  ;;  %s474_s22 = scalar_lea.sflag [#allocation4], %s990_s11  ;;  %s489_s25 = int_to_ptr.hbm [resolvable:$true] %s488_s25 }
  0x3a   : > { %s794_s26 = sshra.s32 %s489_s25, 4  ;;  %s800_s1 = scalar_lea.hbm %s1093_s5, 128  ;;  %s795_s26 = int_to_ptr.hbm [resolvable:$true] %s794_s26 }
  0x3b   : > { %s796_s13 = scalar_lea.hbm %s795_s26, 64  ;;  %p801_p0 = scmp.lt.s32.totalorder %s795_s26, %s1093_s5 }
  0x3c   : > { %p797_p4 = scmp.ne.s32.totalorder %s795_s26, %s796_s13  ;;  %p802_p7 = scmp.lt.s32.totalorder %s800_s1, %s796_s13 }
  0x3d   : > { %304 = vadd.xlane.f32.xlu1 %v1013_v3  ;;  %306 = vadd.xlane.f32.xlu2 %v1015_v4 }
  0x3e   : > { %280 = vadd.xlane.f32.xlu0 %v1017_v5  ;;  %p798_p6 = pnand %p797_p4, %p942_p11  ;;  %p803_p5 = por %p802_p7, %p801_p0 }
  0x40   : > { %p799_p13 = pneg %p798_p6 }
  0x42   : > { %p804_p8 = pnand %p803_p5, %p799_p13 }
  0x45   : > { %292 = vmax.xlane.f32.xlu2 %v1017_v5  ;;  %290 = vmax.xlane.f32.xlu1 %v1008_v2 }
  0x46   : > { %284 = vadd.xlane.f32.xlu0 %v1022_v6 }
  0x4d   : > { %316 = vmax.xlane.f32.xlu2 %v1013_v3  ;;  %314 = vmax.xlane.f32.xlu1 %v1004_v0 }
  0x4e   : > { %308 = vadd.xlane.f32.xlu0 %v1027_v7 }
  0x55   : > { %318 = vmax.xlane.f32.xlu1 %v1015_v4  ;;  %296 = vmax.xlane.f32.xlu2 %v1022_v6 }
  0x56   : > { %294 = vmax.xlane.f32.xlu0 %v1006_v1 }
  0x5e   : > { %320 = vmax.xlane.f32.xlu0 %v1027_v7 }
  0xa8   : > { %v303_v8 = vpop.xlane.xlu1 %302  ;;  %v283_v9 = vpop.xlane.xlu2 %282 }
  0xa9   : > { %v279_v10 = vpop.xlane.xlu0 %278 }
  0xaa   : > { %v310_v23 = vadd.f32 %v303_v8, %v279_v10  ;;  %v683_v8 = vld [vmem:[#allocation7] ss:$0 sm:$0xff] }
  0xac   : > { %v326_v30 = vmul.f32 0.00390625, %v310_v23 }
  0xae   : > { %v336_v40 = vperm.slane %v326_v30, %v335_v22 }
  0xb0   : > { %v305_v11 = vpop.xlane.xlu1 %304  ;;  %v307_v13 = vpop.xlane.xlu2 %306 }
  0xb1   : > { %v281_v12 = vpop.xlane.xlu0 %280  ;;  %v312_v24 = vadd.f32 %v307_v13, %v283_v9 }
  0xb2   : > { %v311_v20 = vadd.f32 %v305_v11, %v281_v12 }
  0xb3   : > { %v328_v34 = vmul.f32 0.00390625, %v312_v24  ;;  %v407_v24 = vld [vmem:[%s1092_s4] sm:$0x1] }
  0xb4   : > { %v327_v27 = vmul.f32 0.00390625, %v311_v20 }
  0xb5   : > { %v342_v43 = vperm.slane %v328_v34, %v341_v33 }
  0xb6   : > { %v338_v36 = vperm.slane %v327_v27, %v337_v26 }
  0xb8   : > { %v291_v14 = vpop.xlane.xlu1 %290  ;;  %v293_v16 = vpop.xlane.xlu2 %292  ;;  %v340_v46 = vsel %vm339_vm0, %v338_v36, %v336_v40 }
  0xb9   : > { %v285_v15 = vpop.xlane.xlu0 %284  ;;  %v344_v54 = vsel %vm343_vm1, %v342_v43, %v340_v46 }
  0xc0   : > { %v315_v17 = vpop.xlane.xlu1 %314  ;;  %v317_v21 = vpop.xlane.xlu2 %316 }
  0xc1   : > { %v309_v18 = vpop.xlane.xlu0 %308  ;;  %v323_v31 = vmax.f32 %v293_v16, %v317_v21  ;;  %v322_v32 = vmax.f32 %v291_v14, %v315_v17  ;;  %v684_v17 = vld [vmem:[%s1091_s3] ss:$0 sm:$0xff] }
  0xc2   : > { %v313_v28 = vadd.f32 %v309_v18, %v285_v15  ;;  %v434_v15 = vshrl.u32 %v334_v19, 7  ;;  %v685_v18 = vld [vmem:[%s1091_s3 + $0x1] ss:$0 sm:$0xff] }
  0xc3   : > { %v355_v41 = vperm.slane %v323_v31, %v337_v26  ;;  %v354_v42 = vperm.slane %v322_v32, %v335_v22 }
  0xc4   : > { %v329_v38 = vmul.f32 0.00390625, %v313_v28  ;;  %676 = vset.pattern.permute.xlu2 %v434_v15  ;;  %v447_v16 = vadd.s32 16, %v434_v15 }
  0xc5   : > { %v356_v49 = vsel %vm339_vm0, %v355_v41, %v354_v42 }
  0xc6   : > { %v346_v47 = vperm.slane %v329_v38, %v345_v37 }
  0xc8   : > { %v319_v29 = vpop.xlane.xlu1 %318  ;;  %v297_v39 = vpop.xlane.xlu2 %296  ;;  %v348_v55 = vsel %vm347_vm2, %v346_v47, %v344_v54 }
  0xc9   : > { %v295_v25 = vpop.xlane.xlu0 %294 }
  0xca   : > { %v324_v35 = vmax.f32 %v295_v25, %v319_v29  ;;  %v408_v25 = vmul.f32 2.0, %v407_v24 }
  0xcc   : > { %v357_v44 = vperm.slane %v324_v35, %v341_v33  ;;  %v453_v33 = vadd.s32 24, %v434_v15 }
  0xce   : > { %v358_v53 = vsel %vm343_vm1, %v357_v44, %v356_v49 }
  0xd1   : > { %v321_v45 = vpop.xlane.xlu0 %320 }
  0xd2   : > { %v325_v48 = vmax.f32 %v297_v39, %v321_v45  ;;  %v441_v45 = vadd.s32 8, %v434_v15 }
  0xd4   : > { %v359_v50 = vperm.slane %v325_v48, %v345_v37 }
  0xd6   : > { %v360_v56 = vsel %vm347_vm2, %v359_v50, %v358_v53 }
  0xd7   : > { %v363_v57 = vsel %vm362_vm3, %v348_v55, %v360_v56 }
  0xd8   : > { %v388_v58 = vmul.f32 %v681_v51, %v363_v57  ;;  %v366_v59 = vmul.f32 %v682_v52, %v363_v57 }
  0xda   : > { %v389_v60 = vsel %vm367_vm4, %v388_v58, 0.0  ;;  %v368_v61 = vsel %vm367_vm4, %v366_v59, 0.0 }
  0xdb   : > { %390 = vadd.xlane.f32.xlu2 %v389_v60  ;;  %369 = vadd.xlane.f32.xlu1 %v368_v61 }
 0x14e   : > { %v391_v9 = vpop.xlane.xlu2 %390  ;;  %v370_v10 = vpop.xlane.xlu1 %369 }
 0x14f   : > { %v392_v11 = vadd.f32 %v683_v8, %v391_v9  ;;  %v375_v12 = vadd.f32 %v683_v8, %v370_v10 }
 0x151   : > { %v393_v13 = vmax.f32 %v392_v11, 0.0  ;;  %v376_v14 = vmax.f32 %v375_v12, 0.0 }
 0x153   : > { %397 = vperm.xlu1 %675, %v393_v13   ;;  %380 = vperm.xlu0 %674, %v376_v14  }
 0x15b   : > { %678 = vset.pattern.permute.xlu1 %v447_v16  ;;  %680 = vset.pattern.permute.xlu0 %v453_v33 }
 0x1c5   : > { %v381_v20 = vpop.permute.xlu0 %380  ;;  %v398_v21 = vpop.permute.xlu1 %397 }
 0x1c6   : > { %v384_v22 = vmul.f32 %v684_v17, %v381_v20  ;;  %v401_v23 = vmul.f32 %v685_v18, %v398_v21 }
 0x1c8   : > { %v402_v19 = vadd.f32 %v401_v23, %v384_v22 }
 0x1ca   : > { %v404_v26 = vrot.slane %v402_v19, 1 }
 0x1cc   : > { %v406_v27 = vadd.f32 %v404_v26, %v402_v19 }
 0x1ce   : > { %v409_v28 = vadd.f32 %v408_v25, %v406_v27 }
 0x1d0   : > { %v410_v29 = vsub.f32 0.0, %v409_v28 }
 0x1d2   : > { %v411_v30 = vmul.f32 1.442695, %v410_v29 }
 0x1d4   : > { %686 = vpow2.f32 %v411_v30 }
 0x1da   : > { %v687_v31 = vpop.eup %686 }
 0x1db   : > { %v413_v32 = vadd.f32 1.0, %v687_v31 }
 0x1dd   : > { %688 = vrcp.f32 %v413_v32  ;;  %v425_v37 = vand.u32 2147483648, %v413_v32  ;;  %v423_v39 = vand.u32 2147483647, %v413_v32  ;;  %vm419_vm6 = vweird.f32 %v413_v32 }
 0x1df   : > { %v426_v41 = vor.u32 1.1754944e-38, %v425_v37  ;;  %vm424_vm8 = vcmp.eq.f32.partialorder %v423_v39, 8.507059e+37 }
 0x1e3   : > { %v689_v34 = vpop.eup %688 }
 0x1e4   : > { %v415_v35 = vmul.f32 %v689_v34, %v413_v32  ;;  %vm420_vm5 = vweird.f32 %v689_v34 }
 0x1e5   : > { %vm421_vm7 = vmor %vm419_vm6, %vm420_vm5 }
 0x1e6   : > { %v416_v36 = vsub.f32 1.0, %v415_v35 }
 0x1e8   : > { %v417_v38 = vmul.f32 %v689_v34, %v416_v36 }
 0x1ea   : > { %v418_v40 = vadd.f32 %v689_v34, %v417_v38 }
 0x1ec   : > { %v422_v42 = vsel %vm421_vm7, %v689_v34, %v418_v40 }
 0x1ed   : > { %v427_v43 = vsel %vm424_vm8, %v426_v41, %v422_v42 }
 0x1ee   : > { %v432_v44 = vperm.slane %v427_v43, 0 }
 0x1f0   : > { %449 = vperm.xlu1 %678, %v432_v44   ;;  %437 = vperm.xlu2 %676, %v432_v44  }
 0x1f8   : > { %677 = vset.pattern.permute.xlu2 %v441_v45 }
 0x200   : > { %443 = vperm.xlu2 %677, %v432_v44  }
 0x208   : > { %679 = vset.pattern.permute.xlu2 %v453_v33 }
 0x210   : > { %455 = vperm.xlu2 %679, %v432_v44  }
 0x24a   : > { %v438_v46 = vpop.permute.xlu2 %437 }
 0x24b   : > { %v457_v47 = vmul.f32 %v438_v46, %v1008_v2  ;;  %v458_v48 = vmul.f32 %v438_v46, %v1004_v0 }
 0x24d   : > { %465 = vst [vmem:[%s273_s12] sm:$0xff] %v457_v47 }
 0x24e   : > { %466 = vst [vmem:[%s273_s12 + $0x8] sm:$0xff] %v458_v48 }
 0x25a   : > { %v444_v49 = vpop.permute.xlu2 %443 }
 0x25b   : > { %v459_v50 = vmul.f32 %v444_v49, %v1017_v5  ;;  %v460_v51 = vmul.f32 %v444_v49, %v1013_v3 }
 0x25d   : > { %467 = vst [vmem:[%s273_s12 + $0x10] sm:$0xff] %v459_v50 }
 0x25e   : > { %468 = vst [vmem:[%s273_s12 + $0x18] sm:$0xff] %v460_v51 }
 0x262   : > { %v450_v52 = vpop.permute.xlu1 %449 }
 0x263   : > { %v461_v53 = vmul.f32 %v450_v52, %v1006_v1  ;;  %v462_v2 = vmul.f32 %v450_v52, %v1015_v4 }
 0x265   : > { %469 = vst [vmem:[%s273_s12 + $0x20] sm:$0xff] %v461_v53 }
 0x266   : > { %470 = vst [vmem:[%s273_s12 + $0x28] sm:$0xff] %v462_v2 }
 0x26a   : > { %v456_v0 = vpop.permute.xlu2 %455 }
 0x26b   : > { %v463_v3 = vmul.f32 %v456_v0, %v1022_v6  ;;  %v464_v5 = vmul.f32 %v456_v0, %v1027_v7 }
 0x26d   : > { %471 = vst [vmem:[%s273_s12 + $0x30] sm:$0xff] %v463_v3 }
 0x26e   : > { %472 = vst [vmem:[%s273_s12 + $0x38] sm:$0xff] %v464_v5 }
 0x26f   : > { %807 = shalt.err (!%p804_p8)
}
 0x270   : > { %s858_s11 = smov 256   ;;  %s859_s16 = smov 16  }
 0x271   : > { %611 = dma.vmem_to_hbm [thread:$0]  (%p942_p11), %s487_s8, 1024, %s489_s25, %s474_s22, %s858_s11, %s858_s11, %s859_s16  }
 0x272 PF: > { %s503_s10 = sand.u32 1, %s838_s18   ;;  %p1104_p9 = scmp.ge.s32.totalorder %s850_s21, 2 }
 0x273   : > { %s504_s28 = scalar_lea.sflag [#allocation4], %s503_s10 }
 0x274   : > { %p625_p10 = pnand %p1104_p9, %p946_p12 }
 0x276   : > { %p626_p1 = pneg %p625_p10 }
 0x278   : > { %833 = dma.done.wait (%p626_p1), %s504_s28, 1024  }
 0x279   : > { %835 = vsyncadd (%p626_p1), %s504_s28, 4294966272  ;;  %p19_p2 = scmp.ge.s32.totalorder %s915_s24, 4   ;;  %s1105_s18 = smov %s842_s19 }
 0x27a   : > { %s1106_s19 = smov %s846_s20  ;;  %s1107_s20 = smov %s927_s27 }
 0x27b   : > { %s1108_s21 = smov %s915_s24  ;;  %21 = sbr.rel (!%p19_p2) target bundleno = 9 (0x9), region = 93 }
 0x280   :  { %510 = vsyncpa [#allocation3], 1 }
 0x281   :  { %512 = vsyncpa [#allocation3 + $0x1], 1 }
 0x282   :  { %513 = vsyncpa [#allocation6], 1 }
 0x283   :  { %514 = vsyncpa [#allocation4], 1 }
 0x284   :  { %516 = vsyncpa [#allocation4 + $0x1], 1 }

</bundles_post_ra>
